<compile_context>
chip_gen: v6e
topology: v6e:2x2x1
jax: 0.10.0
libtpu: 0.0.40
codegen_flags: <defaults>
</compile_context>

<pallas_src>
import functools

import jax
import jax.numpy as jnp
from jax import lax
from jax.experimental import pallas as pl
from jax.experimental.pallas import tpu as pltpu


def _round_up(x, m):
    return ((x + m - 1) // m) * m


# ---------------------------------------------------------------------------
# Sparse-mixer top-2 router (exact mirror of masked_sampling_omp_inference).
# Tiny (T x H x E); runs as plain JAX ahead of the expert kernel so selection
# is bit-identical to the module even though experts stream bf16 activations.
# ---------------------------------------------------------------------------
def _sparse_mixer_top2(logits, jitter_eps):
    E = logits.shape[-1]
    vals, idxs = lax.top_k(logits, 2)

    def multiplier(thresh, extra_mask, sel):
        factor = jnp.maximum(jnp.abs(logits), thresh)
        mask = (thresh - logits) / factor > 2.0 * jitter_eps
        masked = jnp.where(mask | extra_mask, -jnp.inf, logits)
        probs = jax.nn.softmax(masked, axis=-1)
        return jnp.take_along_axis(probs, sel, axis=-1)

    oh1 = jax.nn.one_hot(idxs[:, 0], E, dtype=jnp.bool_)
    m1 = multiplier(vals[:, 0:1], jnp.zeros_like(oh1), idxs[:, 0:1])
    m2 = multiplier(vals[:, 1:2], oh1, idxs[:, 1:2])
    return jnp.concatenate([m1, m2], axis=-1), idxs.astype(jnp.int32)


# ---------------------------------------------------------------------------
# Expert SwiGLU kernel.  Grid = (T_tiles, expert_slot, F_tiles).
#   sched_ref / real_ref : SMEM scalar-prefetch tables, length nT*E.
#     sched[t*E + s] = expert id processed at slot s of tile t (hit experts
#     first; padded slots repeat the last hit expert so block indices are
#     unchanged -> no DMA).  real[t*E + s] = 1 iff the slot is a real expert.
# ---------------------------------------------------------------------------
def _expert_kernel(sched_ref, real_ref,
                   x_ref, idx_ref, mul_ref, w1_ref, w3_ref, w2_ref,
                   out_ref, acc_ref):
    t = pl.program_id(0)
    s = pl.program_id(1)
    f = pl.program_id(2)
    nE = pl.num_programs(1)
    nF = pl.num_programs(2)

    @pl.when(jnp.logical_and(s == 0, f == 0))
    def _init():
        acc_ref[...] = jnp.zeros_like(acc_ref)

    # Skip compute entirely for padded slots (no token in this tile routes to
    # any further expert).  Their weight DMA is already skipped because the
    # index maps return an unchanged block index.
    @pl.when(real_ref[t * nE + s] != 0)
    def _compute():
        e = sched_ref[t * nE + s]
        xb = x_ref[...]                                       # (tm, H) bf16
        h1 = jnp.dot(xb, w1_ref[0], preferred_element_type=jnp.float32)
        h3 = jnp.dot(xb, w3_ref[0], preferred_element_type=jnp.float32)

        # Per-token combine weight for this expert (0 when not routed here).
        idx = idx_ref[...]                                    # (tm, 2) int32
        mul = mul_ref[...]                                    # (tm, 2) f32
        w_col = (jnp.where(idx[:, 0:1] == e, mul[:, 0:1], 0.0)
                 + jnp.where(idx[:, 1:2] == e, mul[:, 1:2], 0.0))  # (tm, 1)

        a = (h1 * jax.nn.sigmoid(h1)) * h3 * w_col
        acc_ref[...] += jnp.dot(a.astype(jnp.bfloat16), w2_ref[0],
                                preferred_element_type=jnp.float32)

    @pl.when(jnp.logical_and(s == nE - 1, f == nF - 1))
    def _store():
        out_ref[...] = acc_ref[...].astype(out_ref.dtype)


# ---------------------------------------------------------------------------
# One-time weight preprocessing (hoisted out of the per-call forward path).
# ---------------------------------------------------------------------------
def prepare_phimoe_weights(gate_w, w1, w3, w2):
    """gate_w:(E,H) f32, w1/w3:(E,F,H), w2:(E,H,F) -> contraction-major bf16."""
    return {
        "gate": jnp.asarray(gate_w, jnp.float32),                  # (E, H)
        "w1t": jnp.swapaxes(jnp.asarray(w1, jnp.bfloat16), 1, 2),  # (E, H, F)
        "w3t": jnp.swapaxes(jnp.asarray(w3, jnp.bfloat16), 1, 2),  # (E, H, F)
        "w2t": jnp.swapaxes(jnp.asarray(w2, jnp.bfloat16), 1, 2),  # (E, F, H)
    }


def _pick_tiles(T, H, F):
    """Generation-aware token/FFN tile and VMEM limit."""
    try:
        vmem_cap = pltpu.get_tpu_info().vmem_capacity_bytes
    except Exception:
        vmem_cap = 64 * 1024 * 1024
    if vmem_cap >= 96 * 1024 * 1024:      # v5e / v6e (128 MiB physical VMEM)
        tm_target, tf_cap, vmem_limit = 1024, 1024, 100 * 1024 * 1024
    else:                                  # v7x (64 MiB physical VMEM)
        tm_target, tf_cap, vmem_limit = 512, 512, 56 * 1024 * 1024

    # Largest multiple of 128 dividing F (<= cap); fall back to the full F.
    tf = F
    k = 128
    while k <= min(F, tf_cap):
        if F % k == 0:
            tf = k
        k += 128

    tm = min(tm_target, _round_up(T, 8))

    def est(tm_, tf_):
        return (2 * tm_ * H * 2          # x bf16, double-buffered
                + 2 * tm_ * H * 2        # out bf16, double-buffered
                + tm_ * H * 4            # f32 accumulator scratch
                + 3 * 2 * H * tf_ * 2    # w1/w3/w2 bf16 tiles, double-buffered
                + 3 * tm_ * tf_ * 4      # h1/h3/a temporaries
                + (2 << 20))             # slack (routing inputs, spill)

    while tm > 256 and est(tm, tf) > vmem_limit:
        tm -= 256
    while tf > 128 and F % 128 == 0 and est(tm, tf) > vmem_limit:
        tf_new = tf - 128
        while tf_new > 128 and F % tf_new != 0:
            tf_new -= 128
        if F % tf_new != 0:
            break
        tf = tf_new
    return tm, tf, vmem_limit


# ---------------------------------------------------------------------------
# Forward.
# ---------------------------------------------------------------------------
def phimoe_sparse_moe_block(hidden_states, params, *, router_jitter_noise=0.01):
    B, S, H = hidden_states.shape
    gate_w = params["gate"]
    w1t, w3t, w2t = params["w1t"], params["w3t"], params["w2t"]
    E, _, F = w1t.shape
    T = B * S

    # ---- Router (f32, identical to the torch module's formula). ------------
    x_f32 = hidden_states.reshape(T, H).astype(jnp.float32)
    logits = x_f32 @ gate_w.T                                   # (T, E)
    route_mul, route_idx = _sparse_mixer_top2(logits, router_jitter_noise)

    # ---- Tiling. ------------------------------------------------------------
    tm, tf, vmem_limit = _pick_tiles(T, H, F)
    Tp = _round_up(T, tm)
    nT, nF = Tp // tm, F // tf

    # Padded rows route to the invalid expert id E with weight 0.
    pad = Tp - T
    x_bf16 = jnp.pad(x_f32, ((0, pad), (0, 0))).astype(jnp.bfloat16)
    route_idx = jnp.pad(route_idx, ((0, pad), (0, 0)), constant_values=E)
    route_mul = jnp.pad(route_mul, ((0, pad), (0, 0)))

    # ---- Per-tile expert schedule (scalar prefetch). ------------------------
    tile_idx = route_idx.reshape(nT, tm * 2)
    eids = jnp.arange(E, dtype=jnp.int32)
    hit = (tile_idx[:, :, None] == eids[None, None, :]).any(axis=1)     # (nT,E)
    n_hit = jnp.maximum(hit.sum(axis=-1), 1).astype(jnp.int32)          # (nT,)
    key = jnp.where(hit, 0, E) + eids[None, :]
    order = jnp.argsort(key, axis=-1).astype(jnp.int32)                 # hit-first
    slots = jnp.minimum(eids[None, :], n_hit[:, None] - 1)
    sched = jnp.take_along_axis(order, slots, axis=-1).reshape(-1).astype(jnp.int32)
    is_real = (eids[None, :] < n_hit[:, None]).astype(jnp.int32).reshape(-1)

    # ---- Index maps (scalar-prefetch refs arrive as trailing args). ---------
    def _tok_map(t, s, f, sched_r, real_r):
        return (t, 0)

    def _w13_map(t, s, f, sched_r, real_r):
        r = real_r[t * E + s]
        return (sched_r[t * E + s], 0, f * r + (nF - 1) * (1 - r))

    def _w2_map(t, s, f, sched_r, real_r):
        r = real_r[t * E + s]
        return (sched_r[t * E + s], f * r + (nF - 1) * (1 - r), 0)

    out = pl.pallas_call(
        _expert_kernel,
        out_shape=jax.ShapeDtypeStruct((Tp, H), jnp.bfloat16),
        grid_spec=pltpu.PrefetchScalarGridSpec(
            num_scalar_prefetch=2,
            grid=(nT, E, nF),
            in_specs=[
                pl.BlockSpec((tm, H), _tok_map),       # x (bf16)
                pl.BlockSpec((tm, 2), _tok_map),       # top-2 expert ids
                pl.BlockSpec((tm, 2), _tok_map),       # top-2 routing weights
                pl.BlockSpec((1, H, tf), _w13_map),    # w1^T tile
                pl.BlockSpec((1, H, tf), _w13_map),    # w3^T tile
                pl.BlockSpec((1, tf, H), _w2_map),     # w2^T tile
            ],
            out_specs=pl.BlockSpec((tm, H), _tok_map),
            scratch_shapes=[pltpu.VMEM((tm, H), jnp.float32)],
        ),
        compiler_params=pltpu.CompilerParams(
            dimension_semantics=("parallel", "arbitrary", "arbitrary"),
            vmem_limit_bytes=vmem_limit,
        ),
    )(sched, is_real, x_bf16, route_idx, route_mul, w1t, w3t, w2t)

    return out[:T].reshape(B, S, H).astype(hidden_states.dtype)


# ---------------------------------------------------------------------------
# Pure-JAX reference (mirror of the PyTorch forward) for a correctness check.
# ---------------------------------------------------------------------------
def _reference(hidden_states, gate_w, w1, w3, w2, jitter_eps=0.01):
    B, S, H = hidden_states.shape
    x = hidden_states.reshape(-1, H)
    logits = x @ gate_w.T
    E = w1.shape[0]
    mult, idxs = _sparse_mixer_top2(logits, jitter_eps)
    wc = (jax.nn.one_hot(idxs[:, 0], E) * mult[:, 0:1]
          + jax.nn.one_hot(idxs[:, 1], E) * mult[:, 1:2])
    h1 = jnp.einsum('th,efh->tef', x, w1)
    h3 = jnp.einsum('th,efh->tef', x, w3)
    a = jax.nn.silu(h1) * h3
    o = jnp.einsum('tef,ehf->teh', a, w2)
    out = jnp.einsum('te,teh->th', wc, o)
    return out.reshape(B, S, H)


if __name__ == "__main__":
    # Small, module-consistent shapes: batch=2, seq=8, hidden=64, ffn=128,
    # 8 experts, top_k=2.
    B, S, H, F, E = 2, 8, 64, 128, 8
    key = jax.random.PRNGKey(0)
    kx, kg, k1, k2, k3 = jax.random.split(key, 5)

    hidden_states = jax.random.normal(kx, (B, S, H), jnp.float32)
    gate_w = jax.random.normal(kg, (E, H), jnp.float32) * 0.05   # gate.weight (E,H)
    w1 = jax.random.normal(k1, (E, F, H), jnp.float32) * 0.05    # w1.weight (F,H)
    w2 = jax.random.normal(k2, (E, H, F), jnp.float32) * 0.05    # w2.weight (H,F)
    w3 = jax.random.normal(k3, (E, F, H), jnp.float32) * 0.05    # w3.weight (F,H)

    # Simulate the symmetric per-output-channel int8 quant-dequant the torch
    # module applies to expert weights in __init__ (USE_QUANT path).
    # TODO(synk): trtllm's exact rounding/packing approximated with plain RNE qdq.
    def qdq(w):  # (E, out, in)
        scale = jnp.max(jnp.abs(w), axis=-1, keepdims=True) / 127.0
        q = jnp.clip(jnp.round(w / scale), -128, 127)
        return q * scale

    w1, w2, w3 = qdq(w1), qdq(w2), qdq(w3)

    # One-time weight prep (hoisted out of the forward path / jit trace).
    params = prepare_phimoe_weights(gate_w, w1, w3, w2)
    fwd = jax.jit(functools.partial(phimoe_sparse_moe_block,
                                    router_jitter_noise=0.01))

    out = jax.block_until_ready(fwd(hidden_states, params))
    ref = _reference(hidden_states, gate_w, w1, w3, w2, jitter_eps=0.01)

    max_diff = float(jnp.max(jnp.abs(out - ref)))
    assert out.shape == (B, S, H)
    assert jnp.allclose(out, ref, atol=2e-2, rtol=2e-2), max_diff
    print("KERNEL_OK")
</pallas_src>

<mosaic_0001>
module attributes {stable_mosaic.version = 11 : i64} {
  func.func @_expert_kernel(%arg0: i32, %arg1: i32, %arg2: i32, %arg3: memref<8xi32, #tpu.memory_space<smem>>, %arg4: memref<8xi32, #tpu.memory_space<smem>>, %arg5: memref<16x64xbf16, #tpu.memory_space<vmem>>, %arg6: memref<16x2xi32, #tpu.memory_space<vmem>>, %arg7: memref<16x2xf32, #tpu.memory_space<vmem>>, %arg8: memref<1x64x128xbf16, #tpu.memory_space<vmem>>, %arg9: memref<1x64x128xbf16, #tpu.memory_space<vmem>>, %arg10: memref<1x128x64xbf16, #tpu.memory_space<vmem>>, %arg11: memref<16x64xbf16, #tpu.memory_space<vmem>>, %arg12: memref<16x64xf32, #tpu.memory_space<vmem>>) attributes {dimension_semantics = [#tpu.dimension_semantics<parallel>, #tpu.dimension_semantics<arbitrary>, #tpu.dimension_semantics<arbitrary>], iteration_bounds = array<i64: 1, 8, 1>, scalar_prefetch = 2 : i64, scratch_operands = 1 : i64, tpu.core_type = #tpu.core_type<tc>, window_params = [{transform_indices = @transform_0, window_bounds = array<i64: 16, 64>}, {transform_indices = @transform_1, window_bounds = array<i64: 16, 2>}, {transform_indices = @transform_2, window_bounds = array<i64: 16, 2>}, {transform_indices = @transform_3, window_bounds = array<i64: 1, 64, 128>}, {transform_indices = @transform_4, window_bounds = array<i64: 1, 64, 128>}, {transform_indices = @transform_5, window_bounds = array<i64: 1, 128, 64>}, {transform_indices = @transform_6, window_bounds = array<i64: 16, 64>}]} {
    %c0_i32 = arith.constant 0 : i32
    %0 = arith.cmpi eq, %arg1, %c0_i32 : i32
    %c0_i32_0 = arith.constant 0 : i32
    %1 = arith.cmpi eq, %arg2, %c0_i32_0 : i32
    %2 = arith.andi %0, %1 : i1
    %3 = arith.extui %2 : i1 to i32
    %c0_i32_1 = arith.constant 0 : i32
    %4 = arith.cmpi ne, %3, %c0_i32_1 : i32
    scf.if %4 {
      %cst = arith.constant 0.000000e+00 : f32
      %17 = vector.broadcast %cst : f32 to vector<16x64xf32>
      %c0 = arith.constant 0 : index
      %c0_6 = arith.constant 0 : index
      %18 = vector.load %arg12[%c0, %c0_6] : memref<16x64xf32, #tpu.memory_space<vmem>>, vector<16x64xf32>
      tpu.vector_store %arg12[%c0, %c0_6], %17 {strides = array<i32>} : memref<16x64xf32, #tpu.memory_space<vmem>>, vector<16x64xf32>,
    } else {
    }
    %c8_i32 = arith.constant 8 : i32
    %5 = arith.muli %arg0, %c8_i32 : i32
    %6 = arith.addi %5, %arg1 : i32
    %7 = arith.index_cast %6 : i32 to index
    %8 = memref.load %arg4[%7] : memref<8xi32, #tpu.memory_space<smem>>
    %c0_i32_2 = arith.constant 0 : i32
    %9 = arith.cmpi ne, %8, %c0_i32_2 : i32
    %10 = arith.extui %9 : i1 to i32
    %c0_i32_3 = arith.constant 0 : i32
    %11 = arith.cmpi ne, %10, %c0_i32_3 : i32
    scf.if %11 {
      %c8_i32_6 = arith.constant 8 : i32
      %17 = arith.muli %arg0, %c8_i32_6 : i32
      %18 = arith.addi %17, %arg1 : i32
      %19 = arith.index_cast %18 : i32 to index
      %20 = memref.load %arg3[%19] : memref<8xi32, #tpu.memory_space<smem>>
      %c0 = arith.constant 0 : index
      %c0_7 = arith.constant 0 : index
      %21 = vector.load %arg5[%c0, %c0_7] : memref<16x64xbf16, #tpu.memory_space<vmem>>, vector<16x64xbf16>
      %c0_8 = arith.constant 0 : index
      %c0_9 = arith.constant 0 : index
      %c0_10 = arith.constant 0 : index
      %22 = vector.load %arg8[%c0_8, %c0_9, %c0_10] : memref<1x64x128xbf16, #tpu.memory_space<vmem>>, vector<1x64x128xbf16>
      %23 = vector.shape_cast %22 : vector<1x64x128xbf16> to vector<64x128xbf16>
      %cst = arith.constant dense<0.000000e+00> : vector<16x128xf32>
      %24 = tpu.matmul %21, %23, %cst {dimension_numbers = #tpu.dot_dimension_numbers<[1], [0], [0], [1], [0, 0, 1, 1], [], []>} : vector<16x64xbf16>, vector<64x128xbf16>, vector<16x128xf32> -> vector<16x128xf32>
      %c0_11 = arith.constant 0 : index
      %c0_12 = arith.constant 0 : index
      %c0_13 = arith.constant 0 : index
      %25 = vector.load %arg9[%c0_11, %c0_12, %c0_13] : memref<1x64x128xbf16, #tpu.memory_space<vmem>>, vector<1x64x128xbf16>
      %26 = vector.shape_cast %25 : vector<1x64x128xbf16> to vector<64x128xbf16>
      %cst_14 = arith.constant dense<0.000000e+00> : vector<16x128xf32>
      %27 = tpu.matmul %21, %26, %cst_14 {dimension_numbers = #tpu.dot_dimension_numbers<[1], [0], [0], [1], [0, 0, 1, 1], [], []>} : vector<16x64xbf16>, vector<64x128xbf16>, vector<16x128xf32> -> vector<16x128xf32>
      %c0_15 = arith.constant 0 : index
      %c0_16 = arith.constant 0 : index
      %28 = vector.load %arg6[%c0_15, %c0_16] : memref<16x2xi32, #tpu.memory_space<vmem>>, vector<16x2xi32>
      %c0_17 = arith.constant 0 : index
      %c0_18 = arith.constant 0 : index
      %29 = vector.load %arg7[%c0_17, %c0_18] : memref<16x2xf32, #tpu.memory_space<vmem>>, vector<16x2xf32>
      %30 = vector.extract_strided_slice %28 {offsets = [0, 0], sizes = [16, 1], strides = [1, 1]} : vector<16x2xi32> to vector<16x1xi32>
      %31 = vector.broadcast %20 : i32 to vector<16x1xi32>
      %32 = arith.cmpi eq, %30, %31 : vector<16x1xi32>
      %33 = vector.extract_strided_slice %29 {offsets = [0, 0], sizes = [16, 1], strides = [1, 1]} : vector<16x2xf32> to vector<16x1xf32>
      %cst_19 = arith.constant 0.000000e+00 : f32
      %34 = vector.broadcast %cst_19 : f32 to vector<16x1xf32>
      %35 = arith.select %32, %33, %34 : vector<16x1xi1>, vector<16x1xf32>
      %36 = vector.extract_strided_slice %28 {offsets = [0, 1], sizes = [16, 1], strides = [1, 1]} : vector<16x2xi32> to vector<16x1xi32>
      %37 = vector.broadcast %20 : i32 to vector<16x1xi32>
      %38 = arith.cmpi eq, %36, %37 : vector<16x1xi32>
      %39 = vector.extract_strided_slice %29 {offsets = [0, 1], sizes = [16, 1], strides = [1, 1]} : vector<16x2xf32> to vector<16x1xf32>
      %cst_20 = arith.constant 0.000000e+00 : f32
      %40 = vector.broadcast %cst_20 : f32 to vector<16x1xf32>
      %41 = arith.select %38, %39, %40 : vector<16x1xi1>, vector<16x1xf32>
      %42 = arith.addf %35, %41 : vector<16x1xf32>
      %43 = arith.negf %24 : vector<16x128xf32>
      %44 = math.exp %43 : vector<16x128xf32>
      %cst_21 = arith.constant 1.000000e+00 : f32
      %45 = vector.broadcast %cst_21 : f32 to vector<16x128xf32>
      %46 = arith.addf %45, %44 : vector<16x128xf32>
      %47 = arith.divf %45, %46 : vector<16x128xf32>
      %48 = arith.mulf %24, %47 : vector<16x128xf32>
      %49 = arith.mulf %48, %27 : vector<16x128xf32>
      %50 = vector.broadcast %42 : vector<16x1xf32> to vector<16x128xf32>
      %51 = arith.mulf %49, %50 : vector<16x128xf32>
      %c0_22 = arith.constant 0 : index
      %c0_23 = arith.constant 0 : index
      %52 = vector.load %arg12[%c0_22, %c0_23] : memref<16x64xf32, #tpu.memory_space<vmem>>, vector<16x64xf32>
      %53 = arith.truncf %51 : vector<16x128xf32> to vector<16x128xbf16>
      %c0_24 = arith.constant 0 : index
      %c0_25 = arith.constant 0 : index
      %c0_26 = arith.constant 0 : index
      %54 = vector.load %arg10[%c0_24, %c0_25, %c0_26] : memref<1x128x64xbf16, #tpu.memory_space<vmem>>, vector<1x128x64xbf16>
      %55 = vector.shape_cast %54 : vector<1x128x64xbf16> to vector<128x64xbf16>
      %cst_27 = arith.constant dense<0.000000e+00> : vector<16x64xf32>
      %56 = tpu.matmul %53, %55, %cst_27 {dimension_numbers = #tpu.dot_dimension_numbers<[1], [0], [0], [1], [0, 0, 1, 1], [], []>} : vector<16x128xbf16>, vector<128x64xbf16>, vector<16x64xf32> -> vector<16x64xf32>
      %57 = arith.addf %52, %56 : vector<16x64xf32>
      %c0_28 = arith.constant 0 : index
      %c0_29 = arith.constant 0 : index
      %58 = vector.load %arg12[%c0_28, %c0_29] : memref<16x64xf32, #tpu.memory_space<vmem>>, vector<16x64xf32>
      tpu.vector_store %arg12[%c0_28, %c0_29], %57 {strides = array<i32>} : memref<16x64xf32, #tpu.memory_space<vmem>>, vector<16x64xf32>,
    } else {
    }
    %c7_i32 = arith.constant 7 : i32
    %12 = arith.cmpi eq, %arg1, %c7_i32 : i32
    %c0_i32_4 = arith.constant 0 : i32
    %13 = arith.cmpi eq, %arg2, %c0_i32_4 : i32
    %14 = arith.andi %12, %13 : i1
    %15 = arith.extui %14 : i1 to i32
    %c0_i32_5 = arith.constant 0 : i32
    %16 = arith.cmpi ne, %15, %c0_i32_5 : i32
    scf.if %16 {
      %c0 = arith.constant 0 : index
      %c0_6 = arith.constant 0 : index
      %17 = vector.load %arg12[%c0, %c0_6] : memref<16x64xf32, #tpu.memory_space<vmem>>, vector<16x64xf32>
      %18 = arith.truncf %17 : vector<16x64xf32> to vector<16x64xbf16>
      %c0_7 = arith.constant 0 : index
      %c0_8 = arith.constant 0 : index
      %19 = vector.load %arg11[%c0_7, %c0_8] : memref<16x64xbf16, #tpu.memory_space<vmem>>, vector<16x64xbf16>
      tpu.vector_store %arg11[%c0_7, %c0_8], %18 {strides = array<i32>} : memref<16x64xbf16, #tpu.memory_space<vmem>>, vector<16x64xbf16>,
    } else {
    }
    return
  }
  func.func @transform_0(%arg0: i32, %arg1: i32, %arg2: i32, %arg3: memref<8xi32, #tpu.memory_space<smem>>, %arg4: memref<8xi32, #tpu.memory_space<smem>>) -> (i32, i32) {
    %c0_i32 = arith.constant 0 : i32
    %c0_i32_0 = arith.constant 0 : i32
    return %arg0, %c0_i32 : i32, i32
  }
  func.func @transform_1(%arg0: i32, %arg1: i32, %arg2: i32, %arg3: memref<8xi32, #tpu.memory_space<smem>>, %arg4: memref<8xi32, #tpu.memory_space<smem>>) -> (i32, i32) {
    %c0_i32 = arith.constant 0 : i32
    %c0_i32_0 = arith.constant 0 : i32
    return %arg0, %c0_i32 : i32, i32
  }
  func.func @transform_2(%arg0: i32, %arg1: i32, %arg2: i32, %arg3: memref<8xi32, #tpu.memory_space<smem>>, %arg4: memref<8xi32, #tpu.memory_space<smem>>) -> (i32, i32) {
    %c0_i32 = arith.constant 0 : i32
    %c0_i32_0 = arith.constant 0 : i32
    return %arg0, %c0_i32 : i32, i32
  }
  func.func @transform_3(%arg0: i32, %arg1: i32, %arg2: i32, %arg3: memref<8xi32, #tpu.memory_space<smem>>, %arg4: memref<8xi32, #tpu.memory_space<smem>>) -> (i32, i32, i32) {
    %c8_i32 = arith.constant 8 : i32
    %0 = arith.muli %arg0, %c8_i32 : i32
    %1 = arith.addi %0, %arg1 : i32
    %2 = arith.index_cast %1 : i32 to index
    %3 = memref.load %arg4[%2] : memref<8xi32, #tpu.memory_space<smem>>
    %c8_i32_0 = arith.constant 8 : i32
    %4 = arith.muli %arg0, %c8_i32_0 : i32
    %5 = arith.addi %4, %arg1 : i32
    %6 = arith.index_cast %5 : i32 to index
    %7 = memref.load %arg3[%6] : memref<8xi32, #tpu.memory_space<smem>>
    %8 = arith.muli %arg2, %3 : i32
    %c1_i32 = arith.constant 1 : i32
    %9 = arith.subi %c1_i32, %3 : i32
    %c0_i32 = arith.constant 0 : i32
    %10 = arith.muli %c0_i32, %9 : i32
    %11 = arith.addi %8, %10 : i32
    %c0_i32_1 = arith.constant 0 : i32
    %c0_i32_2 = arith.constant 0 : i32
    return %7, %c0_i32_1, %11 : i32, i32, i32
  }
  func.func @transform_4(%arg0: i32, %arg1: i32, %arg2: i32, %arg3: memref<8xi32, #tpu.memory_space<smem>>, %arg4: memref<8xi32, #tpu.memory_space<smem>>) -> (i32, i32, i32) {
    %c8_i32 = arith.constant 8 : i32
    %0 = arith.muli %arg0, %c8_i32 : i32
    %1 = arith.addi %0, %arg1 : i32
    %2 = arith.index_cast %1 : i32 to index
    %3 = memref.load %arg4[%2] : memref<8xi32, #tpu.memory_space<smem>>
    %c8_i32_0 = arith.constant 8 : i32
    %4 = arith.muli %arg0, %c8_i32_0 : i32
    %5 = arith.addi %4, %arg1 : i32
    %6 = arith.index_cast %5 : i32 to index
    %7 = memref.load %arg3[%6] : memref<8xi32, #tpu.memory_space<smem>>
    %8 = arith.muli %arg2, %3 : i32
    %c1_i32 = arith.constant 1 : i32
    %9 = arith.subi %c1_i32, %3 : i32
    %c0_i32 = arith.constant 0 : i32
    %10 = arith.muli %c0_i32, %9 : i32
    %11 = arith.addi %8, %10 : i32
    %c0_i32_1 = arith.constant 0 : i32
    %c0_i32_2 = arith.constant 0 : i32
    return %7, %c0_i32_1, %11 : i32, i32, i32
  }
  func.func @transform_5(%arg0: i32, %arg1: i32, %arg2: i32, %arg3: memref<8xi32, #tpu.memory_space<smem>>, %arg4: memref<8xi32, #tpu.memory_space<smem>>) -> (i32, i32, i32) {
    %c8_i32 = arith.constant 8 : i32
    %0 = arith.muli %arg0, %c8_i32 : i32
    %1 = arith.addi %0, %arg1 : i32
    %2 = arith.index_cast %1 : i32 to index
    %3 = memref.load %arg4[%2] : memref<8xi32, #tpu.memory_space<smem>>
    %c8_i32_0 = arith.constant 8 : i32
    %4 = arith.muli %arg0, %c8_i32_0 : i32
    %5 = arith.addi %4, %arg1 : i32
    %6 = arith.index_cast %5 : i32 to index
    %7 = memref.load %arg3[%6] : memref<8xi32, #tpu.memory_space<smem>>
    %8 = arith.muli %arg2, %3 : i32
    %c1_i32 = arith.constant 1 : i32
    %9 = arith.subi %c1_i32, %3 : i32
    %c0_i32 = arith.constant 0 : i32
    %10 = arith.muli %c0_i32, %9 : i32
    %11 = arith.addi %8, %10 : i32
    %c0_i32_1 = arith.constant 0 : i32
    %c0_i32_2 = arith.constant 0 : i32
    return %7, %11, %c0_i32_1 : i32, i32, i32
  }
  func.func @transform_6(%arg0: i32, %arg1: i32, %arg2: i32, %arg3: memref<8xi32, #tpu.memory_space<smem>>, %arg4: memref<8xi32, #tpu.memory_space<smem>>) -> (i32, i32) {
    %c0_i32 = arith.constant 0 : i32
    %c0_i32_0 = arith.constant 0 : i32
    return %arg0, %c0_i32 : i32, i32
  }
}

</mosaic_0001>

<bundles_post_ra>
// kernel: phimoe_sparse_moe_block.1
= control target key start
LH: loop header
LB: loop body
LE: loop exit
PB: predicated region body
PF: predicated region fallthrough
CT: control target
= control target key end

     0   :  { %s1432_s0 = inlined_call_operand.vmem [shape: s32[8], index: 0, kind: input, shape index: {}]   ;;  %s1433_s2 = inlined_call_operand.vmem [shape: bf16[16,64], index: 2, kind: input, shape index: {}]   ;;  %s1434_s3 = inlined_call_operand.vmem [shape: s32[16,2], index: 3, kind: input, shape index: {}]   ;;  %s1435_s4 = inlined_call_operand.vmem [shape: f32[16,2], index: 4, kind: input, shape index: {}]   ;;  %s1436_s5 = inlined_call_operand.vmem [shape: bf16[8,64,128], index: 5, kind: input, shape index: {}]   ;;  %s1437_s6 = inlined_call_operand.vmem [shape: bf16[8,64,128], index: 6, kind: input, shape index: {}]   ;;  %s1438_s7 = inlined_call_operand.vmem [shape: bf16[8,128,64], index: 7, kind: input, shape index: {}]   ;;  %s1439_s8 = inlined_call_operand.vmem [shape: bf16[16,64], index: 8, kind: output, shape index: {}]   ;;  %s1440_s1 = inlined_call_operand.vmem [shape: s32[8], index: 1, kind: input, shape index: {}]  }
   0x1   :  { %s13_s29 = sshll.u32 %s1432_s0, 4  ;;  %s17_s10 = sshll.u32 %s1440_s1, 4  ;;  %s14_s29 = int_to_ptr.vmem [resolvable:$true] %s13_s29  ;;  %s18_s10 = int_to_ptr.vmem [resolvable:$true] %s17_s10 }
   0x2   :  { %s1208_s11 = scalar_lea.vmem %s14_s29, 16  ;;  %p1213_p1 = scmp.lt.s32.totalorder %s14_s29, %s14_s29 }
   0x3   :  { %p1209_p0 = scmp.ne.s32.totalorder %s14_s29, %s1208_s11  ;;  %p1214_p2 = scmp.lt.s32.totalorder %s1208_s11, %s1208_s11 }
   0x5   :  { %p1215_p3 = por %p1214_p2, %p1213_p1 }
   0x7   :  { %p1216_p4 = pnand %p1215_p3, %p1209_p0 }
   0x9   :  { %1219 = shalt.err (!%p1216_p4)  }
   0xa   :  { %s1258_s12 = smov [#allocation4]   ;;  %s1220_s13 = scalar_lea.vmem %s18_s10, 16 }
   0xb   :  { %16 = dma.vmem_to_smem %s14_s29, 16, %s1258_s12, [#allocation3] }
   0xc   :  { %p1221_p5 = scmp.ne.s32.totalorder %s18_s10, %s1220_s13  ;;  %p1225_p6 = scmp.lt.s32.totalorder %s18_s10, %s18_s10 }
   0xd   :  { %p1226_p7 = scmp.lt.s32.totalorder %s1220_s13, %s1220_s13 }
   0xf   :  { %p1227_p8 = por %p1226_p7, %p1225_p6 }
  0x11   :  { %p1228_p9 = pnand %p1227_p8, %p1221_p5 }
  0x13   :  { %1231 = shalt.err (!%p1228_p9)  }
  0x14   :  { %s1259_s0 = smov [#allocation5]  }
  0x15   :  { %20 = dma.vmem_to_smem %s18_s10, 16, %s1259_s0, [#allocation3] }
  0x16   :  { %1244 = dma.done.wait [#allocation3], 32 }
  0x17   :  { %1245 = vsyncadd [#allocation3], 4294967264 }
  0x18   :  { %22 = sfence }
  0x19   :  { %s1316_s1 = smov 0   ;;  %s1318_s14 = smov 0  }
  0x1a   :  { %s1320_s15 = smov 0  }
  0x1b LB: > { %s43_s16 = sadd.s32 1, %s1252_s14  ;;  %p1043_p10 = scmp.ge.s32.totalorder %s1256_s15, 1  ;;  %s1256_s15 = sphi %s1320_s15, %s28_s15   ;;  %s1252_s14 = sphi %s1318_s14, %s1442_s14   ;;  %s1248_s1 = sphi %s1316_s1, %s1441_s1  }
  0x1c   : > { %p45_p11 = scmp.ge.s32.totalorder %s43_s16, 8  ;;  %p373_p12 = scmp.lt.s32.totalorder %s1256_s15, 9 }
  0x1e   : > { %s1444_s16 = smov (%p45_p11, %s43_s16), 0  ;;  %p374_p13 = pnand %p1043_p10, %p373_p12 }
  0x1f   : > { %s474_s17 = sld [smem:[#allocation4 + %s1248_s1]] (!%p374_p13)  ;;  %p534_p0 = scmp.eq.s32.totalorder (!%p374_p13), %s1248_s1, 0 }
  0x20   : > { %377 = sbr.rel (%p374_p13) target bundleno = 525 (0x20d), region = 44  ;;  %s492_s18 = sld [smem:[#allocation4 + %s1248_s1]] (!%p374_p13) }
  0x21   : > { %s510_s19 = sld [smem:[#allocation4 + %s1248_s1]] (!%p374_p13) }
  0x25   : > { %p476_p1 = scmp.lt.s32.totalorder %s474_s17, 7  ;;  %vm540_vm0 = vcmask (%p534_p0), 523264   ;;  %v1260_v0 = vmov (%p534_p0), 0.0  }
  0x26   : > { %p494_p2 = scmp.lt.s32.totalorder %s492_s18, 7  ;;  %541 = vst.msk [vmem:[#allocation2] sm:$0xff] (%p534_p0), %vm540_vm0, %v1260_v0  ;;  %542 = vst.msk [vmem:[#allocation2 + $0x8] sm:$0xff] (%p534_p0), %vm540_vm0, %v1260_v0 }
  0x27   : > { %s1446_s17 = smov (!%p476_p1, %s474_s17), 7  ;;  %p513_p3 = scmp.lt.s32.totalorder %s510_s19, 7 }
  0x28   : > { %s1448_s18 = smov (!%p494_p2, %s492_s18), 7  ;;  %s1080_s20 = sshll.u32 %s1446_s17, 5 }
  0x29   : > { %s1343_s23 = scalar_lea.vmem %s1436_s5, %s1080_s20  ;;  %s1081_s24 = sshll.u32 %s1448_s18, 5 }
  0x2a   : > { %s1348_s27 = scalar_lea.vmem %s1437_s6, %s1081_s24  ;;  %s1450_s19 = smov (!%p513_p3, %s510_s19), 7 }
  0x2b   : > { %s1082_s28 = sshll.u32 %s1450_s19, 6  ;;  %539 = sbr.rel (!%p534_p0) target bundleno = 48 (0x30), region = 48 }
  0x2c   : > { %s1353_s9 = scalar_lea.vmem %s1438_s7, %s1082_s28 }
  0x30 PF: > { %s545_s10 = sld [smem:[#allocation5 + %s1248_s1]] }
  0x36   : > { %p1051_p4 = scmp.eq.s32.totalorder %s545_s10, 0 }
  0x37   : > { %s550_s11 = sld [smem:[#allocation4 + %s1248_s1]] (!%p1051_p4)  ;;  %s1264_s22 = smov (!%p1051_p4), 127  }
  0x38   : > { %549 = sbr.rel (%p1051_p4) target bundleno = 515 (0x203), region = 52 }
  0x3d   : > { %v1183_v1 = vld [vmem:[%s1343_s23 + $0x18] sm:$0xff]   ;;  %v1261_v2 = vmov 0.0   ;;  %v1184_v3 = vld [vmem:[%s1343_s23 + $0x10] sm:$0xff]   ;;  %v708_v4 = vld [vmem:[%s1434_s3] sm:$0xff]  ;;  %vm1262_vm1 = vmmov 0   ;;  %v1263_v7 = vmov 0   ;;  %v712_v10 = vstv %s550_s11 }
  0x3e   : > { %1106 = vmatprep.subr.bf16.mxu1 %v1261_v2  ;;  %1130 = vmatprep.subr.bf16.mxu0 %v1261_v2  ;;  %v710_v5 = vld [vmem:[%s1435_s4] sm:$0xff]  ;;  %v1185_v6 = vld [vmem:[%s1343_s23 + $0x8] sm:$0xff]   ;;  %vm713_vm2 = vcmp.eq.s32.totalorder %v708_v4, %v712_v10  ;;  %vm590_vm4 = vcmask 523264   ;;  %v1188_v15 = vld [vmem:[%s1348_s27 + $0x18] sm:$0xff]  }
  0x3f   : > { %1107 = vmatpush3.bf16.msra.mxu1 %v1183_v1  ;;  %1114 = vmatprep.mubr.msk.bf16.mxu1 %vm1262_vm1, %v1261_v2  ;;  %v709_v8 = vld [vmem:[%s1434_s3 + $0x8] sm:$0xff]  ;;  %v715_v11 = vsel %vm713_vm2, %v710_v5, 0.0  ;;  %v1186_v13 = vld [vmem:[%s1343_s23] sm:$0xff]   ;;  %v1189_v16 = vld [vmem:[%s1348_s27 + $0x10] sm:$0xff]  }
  0x40   : > { %1108 = vmatprep.subr.bf16.mxu1 %v1261_v2  ;;  %1181 = vset.pattern.permute.xlu1 %v1263_v7  ;;  %v711_v9 = vld [vmem:[%s1435_s4 + $0x8] sm:$0xff]  ;;  %vm714_vm3 = vcmp.eq.s32.totalorder %v709_v8, %v712_v10  ;;  %v1187_v14 = vld [vmem:[%s1433_s2] sm:$0xff]   ;;  %v1192_v19 = vld [vmem:[%s1353_s9 + $0x38] sm:$0xff]  }
  0x41   : > { %1146 = vmatprep.mubr.msk.bf16.mxu0 %vm1262_vm1, %v1261_v2  ;;  %1182 = vset.pattern.permute.xlu0 %v1263_v7  ;;  %v716_v12 = vsel %vm714_vm3, %v711_v9, 0.0  ;;  %v1190_v17 = vld [vmem:[%s1348_s27 + $0x8] sm:$0xff]   ;;  %v1191_v18 = vld [vmem:[%s1348_s27] sm:$0xff]   ;;  %v1193_v20 = vld [vmem:[%s1353_s9 + $0x30] sm:$0xff]  }
  0x42   : > { %719 = vrot.lane.b32.xlu0 %v715_v11, %s1264_s22  ;;  %1131 = vmatpush3.bf16.msra.mxu0 %v1192_v19  ;;  %v1194_v21 = vld [vmem:[%s1353_s9 + $0x28] sm:$0xff]   ;;  %v1195_v22 = vld [vmem:[%s1353_s9 + $0x20] sm:$0xff]   ;;  %v1196_v23 = vld [vmem:[%s1353_s9 + $0x18] sm:$0xff]  }
  0x43   : > { %1109 = vmatpush3.bf16.msra.mxu1 %v1184_v3  ;;  %1132 = vmatprep.subr.bf16.mxu0 %v1261_v2  ;;  %v1197_v24 = vld [vmem:[%s1353_s9 + $0x10] sm:$0xff]   ;;  %v1198_v25 = vld [vmem:[%s1353_s9 + $0x8] sm:$0xff]   ;;  %v1199_v28 = vld [vmem:[%s1353_s9] sm:$0xff]  }
  0x44   : > { %1110 = vmatprep.subr.bf16.mxu1 %v1261_v2  ;;  %v755_v56 = vld [vmem:[#allocation2] sm:$0xff]  ;;  %v756_v60 = vld [vmem:[#allocation2 + $0x8] sm:$0xff] }
  0x46   : > { %721 = vrot.lane.b32.xlu0 %v716_v12, %s1264_s22  ;;  %1133 = vmatpush3.bf16.msra.mxu0 %v1193_v20 }
  0x47   : > { %1111 = vmatpush3.bf16.msra.mxu1 %v1185_v6  ;;  %1134 = vmatprep.subr.bf16.mxu0 %v1261_v2 }
  0x48   : > { %1112 = vmatprep.subr.bf16.mxu1 %v1261_v2 }
  0x4a   : > { %1135 = vmatpush3.bf16.msra.mxu0 %v1194_v21 }
  0x4b   : > { %1113 = vmatpush3.bf16.msra.mxu1 %v1186_v13  ;;  %1136 = vmatprep.subr.bf16.mxu0 %v1261_v2 }
  0x4c   : > { %1118 = vmatprep.subr.bf16.mxu1 %v1261_v2 }
  0x4e   : > { %1115 = vmatmul.mubr.msk.bf16.vlgmr.msra.gmra.mxu1 %vm590_vm4, %v1187_v14  ;;  %1137 = vmatpush3.bf16.msra.mxu0 %v1195_v22 }
  0x4f   : > { %1119 = vmatpush3.bf16.msra.mxu1 %v1188_v15  ;;  %1126 = vmatprep.mubr.msk.bf16.mxu1 %vm1262_vm1, %v1261_v2 }
  0x50   : > { %1120 = vmatprep.subr.bf16.mxu1 %v1261_v2  ;;  %1138 = vmatprep.subr.bf16.mxu0 %v1261_v2 }
  0x52   : > { %1139 = vmatpush3.bf16.msra.mxu0 %v1196_v23 }
  0x53   : > { %1121 = vmatpush3.bf16.msra.mxu1 %v1189_v16  ;;  %1140 = vmatprep.subr.bf16.mxu0 %v1261_v2 }
  0x54   : > { %1122 = vmatprep.subr.bf16.mxu1 %v1261_v2 }
  0x56   : > { %1141 = vmatpush3.bf16.msra.mxu0 %v1197_v24 }
  0x57   : > { %1123 = vmatpush3.bf16.msra.mxu1 %v1190_v17  ;;  %1142 = vmatprep.subr.bf16.mxu0 %v1261_v2 }
  0x58   : > { %1124 = vmatprep.subr.bf16.mxu1 %v1261_v2 }
  0x5a   : > { %1143 = vmatpush3.bf16.msra.mxu0 %v1198_v25 }
  0x5b   : > { %1125 = vmatpush3.bf16.msra.mxu1 %v1191_v18  ;;  %1144 = vmatprep.subr.bf16.mxu0 %v1261_v2 }
  0x5e   : > { %1127 = vmatmul.mubr.msk.bf16.vlgmr.msra.gmra.mxu1 %vm590_vm4, %v1187_v14  ;;  %1145 = vmatpush3.bf16.msra.mxu0 %v1199_v28 }
  0xb4   : > { %v720_v26 = vpop.permute.xlu0 %719 }
  0xb5   : > { %v725_v27 = vadd.f32 %v720_v26, %v715_v11 }
  0xb7   : > { %745 = vperm.xlu1 %1181, %v725_v27  }
  0xb8   : > { %v722_v29 = vpop.permute.xlu0 %721 }
  0xb9   : > { %v726_v30 = vadd.f32 %v722_v29, %v716_v12 }
  0xbb   : > { %750 = vperm.xlu1 %1181, %v726_v30  }
 0x10e   : > { %v628_v31 = vpop.f32.mrf.mxu1 }
 0x10f   : > { %v1063_v32 = vmul.f32 -1.442695, %v628_v31 }
 0x110   : > { %v1116_v33 = vpop.f32.mrf.mxu1 }
 0x111   : > { %1200 = vpow2.f32 %v1063_v32 }
 0x112   : > { %v631_v34 = vpop.f32.mrf.mxu1 }
 0x113   : > { %v1064_v35 = vmul.f32 -1.442695, %v631_v34 }
 0x114   : > { %v1117_v36 = vpop.f32.mrf.mxu1 }
 0x115   : > { %1202 = vpow2.f32 %v1064_v35 }
 0x11e   : > { %v1201_v37 = vpop.eup %1200  ;;  %v701_v38 = vpop.f32.mrf.mxu1 }
 0x11f   : > { %v733_v40 = vadd.f32 1.0, %v1201_v37 }
 0x120   : > { %v1128_v39 = vpop.f32.mrf.mxu1 }
 0x121   : > { %1204 = vrcp.f32 %v733_v40 }
 0x122   : > { %v1203_v41 = vpop.eup %1202  ;;  %v704_v42 = vpop.f32.mrf.mxu1 }
 0x123   : > { %v734_v43 = vadd.f32 1.0, %v1203_v41 }
 0x124   : > { %v1129_v44 = vpop.f32.mrf.mxu1 }
 0x125   : > { %1206 = vrcp.f32 %v734_v43 }
 0x12e   : > { %v1205_v45 = vpop.eup %1204 }
 0x12f   : > { %v739_v47 = vmul.f32 %v1205_v45, %v628_v31 }
 0x131   : > { %v741_v50 = vmul.f32 %v739_v47, %v701_v38 }
 0x132   : > { %v1207_v46 = vpop.eup %1206  ;;  %v746_v49 = vpop.permute.xlu1 %745 }
 0x133   : > { %v740_v48 = vmul.f32 %v1207_v46, %v631_v34  ;;  %v753_v53 = vmul.f32 %v746_v49, %v741_v50 }
 0x135   : > { %v742_v51 = vmul.f32 %v740_v48, %v704_v42 }
 0x136   : > { %v751_v52 = vpop.permute.xlu1 %750 }
 0x137   : > { %v754_v54 = vmul.f32 %v751_v52, %v742_v51 }
 0x139   : > { %v757_v55 = vpack.c.bf16 %v754_v54, %v753_v53 }
 0x13b   : > { %1147 = vmatmul.mubr.bf16.vlgmr.msra.gmra.mxu0 %v757_v55 }
 0x1fb   : > { %v856_v57 = vpop.f32.mrf.mxu0 }
 0x1fc   : > { %v863_v58 = vadd.f32 %v856_v57, %v755_v56 }
 0x1fd   : > { %v1148_v59 = vpop.f32.mrf.mxu0 }
 0x1fe   : > { %865 = vst.msk [vmem:[#allocation2] sm:$0xff] %vm590_vm4, %v863_v58 }
 0x1ff   : > { %v859_v61 = vpop.f32.mrf.mxu0 }
 0x200   : > { %v864_v62 = vadd.f32 %v859_v61, %v756_v60 }
 0x201   : > { %v1149_v63 = vpop.f32.mrf.mxu0 }
 0x202   : > { %866 = vst.msk [vmem:[#allocation2 + $0x8] sm:$0xff] %vm590_vm4, %v864_v62 }
 0x203 PF: > { %p867_p5 = scmp.eq.s32.totalorder %s1248_s1, 7 }
 0x204   : > { %vm882_vm5 = vcmask (%p867_p5), 519168  }
 0x205   : > { %871 = sbr.rel (!%p867_p5) target bundleno = 525 (0x20d), region = 56  ;;  %v872_v0 = vld [vmem:[#allocation2] sm:$0xff] (%p867_p5) }
 0x206   : > { %v1085_v2 = vpack.c.bf16 (%p867_p5), %v872_v0, %v872_v0 }
 0x208   : > { %883 = vst.msk [vmem:[%s1439_s8] sm:$0xf] (%p867_p5), %vm882_vm5, %v1085_v2 }
 0x209   : > { %v873_v1 = vld [vmem:[#allocation2 + $0x8] sm:$0xff] (%p867_p5) }
 0x20a   : > { %v1086_v3 = vpack.c.bf16 %v873_v1, %v873_v1 }
 0x20c   : > { %884 = vst.msk [vmem:[%s1439_s8 + $0x4] sm:$0xf] %vm882_vm5, %v1086_v3 }
 0x20d PF: > { %s28_s15 = sadd.s32 1, %s1256_s15   ;;  %s1441_s1 = smov %s1252_s14 }
 0x20e   : > { %p25_p6 = scmp.ge.s32.totalorder %s28_s15, 10   ;;  %s1442_s14 = smov %s1444_s16 }
 0x210   :  { %27 = sbr.rel (!%p25_p6) target bundleno = 27 (0x1b), region = 101 }

</bundles_post_ra>
